<compile_context>
chip_gen: v5e
topology: v5e:2x2
jax: 0.10.0
libtpu: 0.0.40
codegen_flags: <defaults>
</compile_context>

<pallas_src>
import jax
import jax.numpy as jnp
from jax.experimental import pallas as pl
from jax.experimental.pallas import tpu as pltpu


# ----------------------------------------------------------------------------
# Kernel: two MXU dots into one f32 accumulator + fused bias add.
# ----------------------------------------------------------------------------
def _adaptor_kernel(hs_ref, ctx_ref, wp_ref, wl_ref, bias_ref, out_ref):
    acc = jnp.dot(hs_ref[...], wp_ref[...], preferred_element_type=jnp.float32)
    acc = acc + jnp.dot(ctx_ref[...], wl_ref[...],
                        preferred_element_type=jnp.float32)
    out_ref[...] = (acc + bias_ref[...].astype(jnp.float32)).astype(out_ref.dtype)


# ----------------------------------------------------------------------------
# Parameter prep: done ONCE (at init time), not per forward call.
# ----------------------------------------------------------------------------
def prepare_params(wp, bp, wl, bl):
    """Fuse biases; assert the weight-layout contract.

    Layout contract (ASSERTED): weights are (in, out), i.e. the TRANSPOSE of
    the raw PyTorch nn.Linear.weight (which is (out, in)).
      wp : (D, D)  == torch proj.weight.T
      bp : (D,)
      wl : (C, D)  == torch linear.weight.T
      bl : (D,)
    Returns (wp, wl, bias(1, D)).  For v6e/v7x at real sizes, cast wp/wl to
    bf16 here (keep bias in f32); the kernel accumulates in f32 either way.
    """
    D = wp.shape[1]
    C = wl.shape[0]
    assert wp.shape == (D, D), "wp must be (in, out) = proj.weight.T"
    assert wl.shape == (C, D), "wl must be (in, out) = linear.weight.T"
    assert bp.shape == (D,) and bl.shape == (D,)
    bias = (bp + bl).reshape(1, D).astype(jnp.float32)
    return wp, wl, bias


def _round_up(x, m):
    return ((x + m - 1) // m) * m


def _pick_block_b(B, D, C, itemsize, min_rows):
    """VMEM-budgeted batch tile.

    Streamed arrays (last_hs, context, out) are double-buffered by the
    pipeline; keep their combined footprint under ~8 MiB so the choice is
    safe on every generation (v7x: 64 MiB physical / 32 MiB scoped default).
    """
    per_row = 2 * (D + C + D) * itemsize          # 2x = double buffering
    fit = max(min_rows, (8 << 20) // max(per_row, 1))
    fit = (fit // min_rows) * min_rows
    if B >= 256:
        # Large batch: >= 2 even grid steps so v7x's 2 TensorCores both work;
        # ~0.35 us/step overhead is negligible at this size (also fine on
        # single-TC v5e/v6e).
        cand = _round_up(-(-B // 2), min_rows)
    else:
        # Small batch: one block = fewest grid steps (optimal on v5e/v6e).
        cand = _round_up(B, min_rows)
    return max(min_rows, min(cand, fit))


# ----------------------------------------------------------------------------
# Wrapper.
# ----------------------------------------------------------------------------
def context_concat_adaptor(last_hs, context, wp, wl, bias, *, block_b=None):
    """Fused forward.

    last_hs : (B, D)
    context : (B, C)
    wp      : (D, D) proj weight, layout (in, out)
    wl      : (C, D) linear weight, layout (in, out)
    bias    : (1, D) pre-fused bias from prepare_params
    returns : (B, D)
    """
    B, D = last_hs.shape
    Bc, C = context.shape
    assert Bc == B
    assert wp.shape == (D, D) and wl.shape == (C, D) and bias.shape == (1, D)

    itemsize = jnp.dtype(last_hs.dtype).itemsize
    min_rows = 8 if itemsize >= 4 else 16          # f32: 8, bf16: 16 sublanes

    if block_b is None:
        block_b = _pick_block_b(B, D, C, itemsize, min_rows)
    block_b = max(min_rows, (block_b // min_rows) * min_rows)

    # Pad the batch so block_b always divides it (stable tiling for any B),
    # slice the padding off afterwards.
    padded_B = _round_up(max(B, block_b), block_b)
    if padded_B != B:
        pad = padded_B - B
        last_hs = jnp.pad(last_hs, ((0, pad), (0, 0)))
        context = jnp.pad(context, ((0, pad), (0, 0)))
    grid = (padded_B // block_b,)

    # Explicit VMEM budget (everything counted double-buffered) + headroom.
    weight_bytes = (D * D + C * D + D) * max(itemsize, 4)
    block_bytes = block_b * (D + C + D) * itemsize
    vmem_limit = int(min(max(2 * (weight_bytes + block_bytes) + (2 << 20),
                             16 << 20), 64 << 20))

    cost = pl.CostEstimate(
        flops=2 * padded_B * (D + C) * D,
        transcendentals=0,
        bytes_accessed=(padded_B * (D + C + D) + D * D + C * D + D) * itemsize,
    )

    out = pl.pallas_call(
        _adaptor_kernel,
        out_shape=jax.ShapeDtypeStruct((padded_B, D), last_hs.dtype),
        grid_spec=pltpu.PrefetchScalarGridSpec(
            num_scalar_prefetch=0,
            grid=grid,
            in_specs=[
                pl.BlockSpec((block_b, D), lambda i: (i, 0)),  # last_hs (streamed)
                pl.BlockSpec((block_b, C), lambda i: (i, 0)),  # context (streamed)
                pl.BlockSpec((D, D), lambda i: (0, 0)),        # Wp (resident)
                pl.BlockSpec((C, D), lambda i: (0, 0)),        # Wl (resident)
                pl.BlockSpec((1, D), lambda i: (0, 0)),        # fused bias (resident)
            ],
            out_specs=pl.BlockSpec((block_b, D), lambda i: (i, 0)),
        ),
        compiler_params=pltpu.CompilerParams(
            dimension_semantics=("parallel",),   # batch axis shards across TCs on v7x
            vmem_limit_bytes=vmem_limit,
        ),
        cost_estimate=cost,
    )(last_hs, context, wp, wl, bias)

    return out[:B] if padded_B != B else out


# ----------------------------------------------------------------------------
# Pure-JAX reference (PyTorch-equivalent math).
# ----------------------------------------------------------------------------
def reference(last_hs, context, wp, bp, wl, bl):
    return last_hs @ wp + bp + context @ wl + bl


if __name__ == "__main__":
    # Small shapes consistent with the module:
    #   combined_dim D = 32 (proj in == out), context_dim C = 16, batch B = 8.
    B, D, C = 8, 32, 16

    key = jax.random.PRNGKey(0)
    k1, k2, k3, k4, k5, k6 = jax.random.split(key, 6)

    last_hs = jax.random.normal(k1, (B, D), dtype=jnp.float32)
    context = jax.random.normal(k2, (B, C), dtype=jnp.float32)

    # Deterministic parameter init (uniform, PyTorch-Linear-style bounds),
    # stored pre-transposed as (in, out).
    wp = jax.random.uniform(k3, (D, D), jnp.float32, -1.0 / D**0.5, 1.0 / D**0.5)
    bp = jax.random.uniform(k4, (D,),   jnp.float32, -1.0 / D**0.5, 1.0 / D**0.5)
    wl = jax.random.uniform(k5, (C, D), jnp.float32, -1.0 / C**0.5, 1.0 / C**0.5)
    bl = jax.random.uniform(k6, (D,),   jnp.float32, -1.0 / C**0.5, 1.0 / C**0.5)

    # Parameter prep happens once (outside the per-call path).
    wp_p, wl_p, bias = prepare_params(wp, bp, wl, bl)

    out = context_concat_adaptor(last_hs, context, wp_p, wl_p, bias)
    out = jax.block_until_ready(out)

    expected = reference(last_hs, context, wp, bp, wl, bl)
    assert out.shape == (B, D)
    assert jnp.allclose(out, expected, atol=1e-5, rtol=1e-5), (
        float(jnp.max(jnp.abs(out - expected))))

    print("KERNEL_OK")
</pallas_src>

<mosaic_0001>
module attributes {stable_mosaic.version = 11 : i64} {
  func.func @_adaptor_kernel(%arg0: i32, %arg1: memref<8x32xf32, #tpu.memory_space<vmem>>, %arg2: memref<8x16xf32, #tpu.memory_space<vmem>>, %arg3: memref<32x32xf32, #tpu.memory_space<vmem>>, %arg4: memref<16x32xf32, #tpu.memory_space<vmem>>, %arg5: memref<1x32xf32, #tpu.memory_space<vmem>>, %arg6: memref<8x32xf32, #tpu.memory_space<vmem>>) attributes {dimension_semantics = [#tpu.dimension_semantics<parallel>], iteration_bounds = array<i64: 1>, scalar_prefetch = 0 : i64, scratch_operands = 0 : i64, tpu.core_type = #tpu.core_type<tc>, window_params = [{transform_indices = @transform_0, window_bounds = array<i64: 8, 32>}, {transform_indices = @transform_1, window_bounds = array<i64: 8, 16>}, {pipeline_mode = #tpu.pipeline_mode<synchronous>, transform_indices = @transform_2, window_bounds = array<i64: 32, 32>}, {pipeline_mode = #tpu.pipeline_mode<synchronous>, transform_indices = @transform_3, window_bounds = array<i64: 16, 32>}, {pipeline_mode = #tpu.pipeline_mode<synchronous>, transform_indices = @transform_4, window_bounds = array<i64: 1, 32>}, {transform_indices = @transform_5, window_bounds = array<i64: 8, 32>}]} {
    %c0 = arith.constant 0 : index
    %c0_0 = arith.constant 0 : index
    %0 = vector.load %arg1[%c0, %c0_0] : memref<8x32xf32, #tpu.memory_space<vmem>>, vector<8x32xf32>
    %c0_1 = arith.constant 0 : index
    %c0_2 = arith.constant 0 : index
    %1 = vector.load %arg3[%c0_1, %c0_2] : memref<32x32xf32, #tpu.memory_space<vmem>>, vector<32x32xf32>
    %cst = arith.constant dense<0.000000e+00> : vector<8x32xf32>
    %2 = tpu.matmul %0, %1, %cst {dimension_numbers = #tpu.dot_dimension_numbers<[1], [0], [0], [1], [0, 0, 1, 1], [], []>} : vector<8x32xf32>, vector<32x32xf32>, vector<8x32xf32> -> vector<8x32xf32>
    %c0_3 = arith.constant 0 : index
    %c0_4 = arith.constant 0 : index
    %3 = vector.load %arg2[%c0_3, %c0_4] : memref<8x16xf32, #tpu.memory_space<vmem>>, vector<8x16xf32>
    %c0_5 = arith.constant 0 : index
    %c0_6 = arith.constant 0 : index
    %4 = vector.load %arg4[%c0_5, %c0_6] : memref<16x32xf32, #tpu.memory_space<vmem>>, vector<16x32xf32>
    %cst_7 = arith.constant dense<0.000000e+00> : vector<8x32xf32>
    %5 = tpu.matmul %3, %4, %cst_7 {dimension_numbers = #tpu.dot_dimension_numbers<[1], [0], [0], [1], [0, 0, 1, 1], [], []>} : vector<8x16xf32>, vector<16x32xf32>, vector<8x32xf32> -> vector<8x32xf32>
    %6 = arith.addf %2, %5 : vector<8x32xf32>
    %c0_8 = arith.constant 0 : index
    %c0_9 = arith.constant 0 : index
    %7 = vector.load %arg5[%c0_8, %c0_9] : memref<1x32xf32, #tpu.memory_space<vmem>>, vector<1x32xf32>
    %8 = vector.broadcast %7 : vector<1x32xf32> to vector<8x32xf32>
    %9 = arith.addf %6, %8 : vector<8x32xf32>
    %c0_10 = arith.constant 0 : index
    %c0_11 = arith.constant 0 : index
    %10 = vector.load %arg6[%c0_10, %c0_11] : memref<8x32xf32, #tpu.memory_space<vmem>>, vector<8x32xf32>
    tpu.vector_store %arg6[%c0_10, %c0_11], %9 {strides = array<i32>} : memref<8x32xf32, #tpu.memory_space<vmem>>, vector<8x32xf32>,
    return
  }
  func.func @transform_0(%arg0: i32) -> (i32, i32) {
    %c0_i32 = arith.constant 0 : i32
    %c0_i32_0 = arith.constant 0 : i32
    return %arg0, %c0_i32 : i32, i32
  }
  func.func @transform_1(%arg0: i32) -> (i32, i32) {
    %c0_i32 = arith.constant 0 : i32
    %c0_i32_0 = arith.constant 0 : i32
    return %arg0, %c0_i32 : i32, i32
  }
  func.func @transform_2(%arg0: i32) -> (i32, i32) {
    %c0_i32 = arith.constant 0 : i32
    %c0_i32_0 = arith.constant 0 : i32
    %c0_i32_1 = arith.constant 0 : i32
    return %c0_i32, %c0_i32_0 : i32, i32
  }
  func.func @transform_3(%arg0: i32) -> (i32, i32) {
    %c0_i32 = arith.constant 0 : i32
    %c0_i32_0 = arith.constant 0 : i32
    %c0_i32_1 = arith.constant 0 : i32
    return %c0_i32, %c0_i32_0 : i32, i32
  }
  func.func @transform_4(%arg0: i32) -> (i32, i32) {
    %c0_i32 = arith.constant 0 : i32
    %c0_i32_0 = arith.constant 0 : i32
    %c0_i32_1 = arith.constant 0 : i32
    return %c0_i32, %c0_i32_0 : i32, i32
  }
  func.func @transform_5(%arg0: i32) -> (i32, i32) {
    %c0_i32 = arith.constant 0 : i32
    %c0_i32_0 = arith.constant 0 : i32
    return %arg0, %c0_i32 : i32, i32
  }
}

</mosaic_0001>

<bundles_post_ra>
// kernel: tpu_custom_call.1
= control target key start
LH: loop header
LB: loop body
LE: loop exit
PB: predicated region body
PF: predicated region fallthrough
CT: control target
= control target key end

     0   :  { %10 = vsyncpa [#allocation3], 0  ;;  %s354_s0 = inlined_call_operand.hbm [shape: f32[8,32], index: 0, kind: input, shape index: {}]   ;;  %s355_s1 = inlined_call_operand.hbm [shape: f32[8,16], index: 1, kind: input, shape index: {}]   ;;  %s356_s2 = inlined_call_operand.hbm [shape: f32[32,32], index: 2, kind: input, shape index: {}]   ;;  %s357_s3 = inlined_call_operand.hbm [shape: f32[16,32], index: 3, kind: input, shape index: {}]   ;;  %s358_s4 = inlined_call_operand.vmem [shape: f32[1,32], index: 4, kind: input, shape index: {}]   ;;  %s359_s5 = inlined_call_operand.hbm [shape: f32[8,32], index: 5, kind: output, shape index: {}]  }
   0x1   :  { %11 = vsyncpa [#allocation6], 0 }
   0x2   :  { %12 = vsyncpa [#allocation9], 0  ;;  %s30_s20 = sshll.u32 %s355_s1, 4  ;;  %s31_s20 = int_to_ptr.hbm [resolvable:$true] %s30_s20 }
   0x3   :  { %13 = vsyncpa [#allocation4], 0  ;;  %s299_s21 = smov [#allocation5]   ;;  %s19_s25 = sshll.u32 %s354_s0, 4  ;;  %s20_s25 = int_to_ptr.hbm [resolvable:$true] %s19_s25 }
   0x4   :  { %s32_s22 = sshll.u32 %s299_s21, 4  ;;  %s300_s26 = smov [#allocation2]   ;;  %s33_s22 = int_to_ptr.vmem [resolvable:$true] %s32_s22 }
   0x5   :  { %35 = dma.hbm_to_vmem [thread:$0]  %s31_s20, 128, %s33_s22, [#allocation6]  }
   0x6   :  { %s21_s27 = sshll.u32 %s300_s26, 4  ;;  %s40_s30 = sshll.u32 %s356_s2, 4  ;;  %s22_s27 = int_to_ptr.vmem [resolvable:$true] %s21_s27  ;;  %s41_s30 = int_to_ptr.hbm [resolvable:$true] %s40_s30 }
   0x7   :  { %24 = dma.hbm_to_vmem [thread:$0]  %s20_s25, 128, %s22_s27, [#allocation3]  }
   0x8   :  { %s301_s1 = smov [#allocation7]   ;;  %s53_s9 = sshll.u32 %s357_s3, 4  ;;  %s54_s9 = int_to_ptr.hbm [resolvable:$true] %s53_s9 }
   0x9   :  { %s42_s6 = sshll.u32 %s301_s1, 4  ;;  %s302_s10 = smov 128   ;;  %s43_s6 = int_to_ptr.vmem [resolvable:$true] %s42_s6 }
   0xa   :  { %s303_s0 = smov 8   ;;  %s304_s11 = smov [#allocation8]  }
   0xb   :  { %48 = dma.hbm_to_vmem [thread:$0]  %s41_s30, 512, %s43_s6, [#allocation6], %s302_s10, %s302_s10, %s303_s0  }
   0xc   :  { %s55_s12 = sshll.u32 %s304_s11, 4  ;;  %s56_s12 = int_to_ptr.vmem [resolvable:$true] %s55_s12 }
   0xd   :  { %61 = dma.hbm_to_vmem [thread:$0]  %s54_s9, 256, %s56_s12, [#allocation9], %s302_s10, %s302_s10, %s303_s0  }
   0xe   :  { %291 = dma.done.wait [#allocation3], 128  }
   0xf   :  { %292 = vsyncadd [#allocation3], 4294967168 }
  0x10   :  { %293 = dma.done.wait [#allocation6], 640  }
  0x11   :  { %294 = vsyncadd [#allocation6], 4294966656 }
  0x12   :  { %295 = dma.done.wait [#allocation9], 256  }
  0x13   :  { %296 = vsyncadd [#allocation9], 4294967040  ;;  %v84_v0 = vld [vmem:[#allocation7 + $0x18] sm:$0xff]  ;;  %v83_v1 = vld [vmem:[#allocation7 + $0x10] sm:$0xff]  ;;  %vm88_vm0 = vcmask 130048   ;;  %vm112_vm1 = vcmask 261120  }
  0x14   :  { %v87_v2 = vld [vmem:[#allocation8 + $0x8] sm:$0xff]  ;;  %128 = vmatpush.msra.mxu1 %v84_v0  ;;  %v86_v3 = vld [vmem:[#allocation8] sm:$0xff]  ;;  %v85_v5 = vld [vmem:[#allocation5] sm:$0xff]  ;;  %s305_s13 = smov [#allocation10]   ;;  %s149_s17 = sshll.u32 %s359_s5, 4  ;;  %s150_s17 = int_to_ptr.hbm [resolvable:$true] %s149_s17 }
  0x15   :  { %106 = vmatpush.msra.mxu0 %v87_v2  ;;  %v82_v4 = vld [vmem:[#allocation7 + $0x8] sm:$0xff]  ;;  %v81_v6 = vld [vmem:[#allocation7] sm:$0xff]  ;;  %v80_v7 = vld [vmem:[#allocation2] sm:$0xff]  ;;  %s147_s14 = sshll.u32 %s305_s13, 4  ;;  %s148_s14 = int_to_ptr.vmem [resolvable:$true] %s147_s14 }
  0x16   :  { %129 = vmatpush.msra.mxu1 %v83_v1  ;;  %v170_v9 = vld [vmem:[%s358_s4] ss:$0 sm:$0xff] }
  0x17   :  { %107 = vmatpush.msra.mxu0 %v86_v3 }
  0x18   :  { %161 = vmatmul.msk.f32.vlgmr.msra.gmra.mxu0 %vm88_vm0, %v85_v5  ;;  %130 = vmatpush.msra.mxu1 %v82_v4 }
  0x1a   :  { %131 = vmatpush.msra.mxu1 %v81_v6 }
  0x1b   :  { %162 = vmatmul.msk.f32.vlgmr.msra.gmra.mxu1 %vm112_vm1, %v80_v7 }
  0x95   :  { %v109_v8 = vpop.f32.mrf.mxu0 }
  0x98   :  { %v133_v10 = vpop.f32.mrf.mxu1 }
  0x99   :  { %v134_v11 = vadd.f32 %v133_v10, %v109_v8 }
  0x9b   :  { %v140_v12 = vadd.f32 %v170_v9, %v134_v11 }
  0x9d   :  { %141 = vst.msk [vmem:[#allocation10] sm:$0xff] %vm112_vm1, %v140_v12 }
  0x9e   :  { %152 = dma.vmem_to_hbm [thread:$0]  %s148_s14, 128, %s150_s17, [#allocation4]  }
  0x9f   :  { %297 = dma.done.wait [#allocation4], 128  }
  0xa0   :  { %298 = vsyncadd [#allocation4], 4294967168 }
  0xa1   :  { %157 = vsyncpa [#allocation3], 1 }
  0xa2   :  { %158 = vsyncpa [#allocation6], 1 }
  0xa3   :  { %159 = vsyncpa [#allocation9], 1 }
  0xa4   :  { %160 = vsyncpa [#allocation4], 1 }

</bundles_post_ra>
